<compile_context>
chip_gen: v7x
topology: tpu7x:2x2x1
jax: 0.10.0
libtpu: 0.0.40
codegen_flags: <defaults>
</compile_context>

<pallas_src>
import functools

import jax
import jax.numpy as jnp
from jax.experimental import pallas as pl
from jax.experimental.pallas import tpu as pltpu


def _attention_kernel(key_ref, value_ref, token_ref, lens_ref, out_ref,
                      m_ref, l_ref, acc_ref, *, seq_len, padded_seq):
    s_idx = pl.program_id(1)
    TB, TS, _ = key_ref.shape

    @pl.when(s_idx == 0)
    def _init():
        m_ref[...] = jnp.full_like(m_ref, -jnp.inf)
        l_ref[...] = jnp.zeros_like(l_ref)
        acc_ref[...] = jnp.zeros_like(acc_ref)

    key = key_ref[...]        # (TB, TS, F)
    value = value_ref[...]    # (TB, TS, F)
    token = token_ref[...]    # (TB, 1,  F)

    # energy = bmm(key, token^T) -> lane-dense (TB, 1, TS), f32 accumulate.
    energy = jnp.einsum('bqf,bkf->bqk', token, key,
                        preferred_element_type=jnp.float32)

    # Semantic mask: positions >= lens[b] filled with -1e-09 (exactly as in
    # the PyTorch source).  Host-side padded columns (pos >= seq_len) are
    # excluded from the softmax entirely via -inf (exp(-inf) = 0); the padded
    # value rows are genuine zeros, so no NaN can leak into the accumulator.
    pos = s_idx * TS + jax.lax.broadcasted_iota(jnp.int32, (TB, 1, TS), 2)
    energy = jnp.where(pos >= lens_ref[...], jnp.float32(-1e-09), energy)
    if padded_seq > seq_len:
        energy = jnp.where(pos >= seq_len, -jnp.inf, energy)

    # Online-softmax update (numerically identical to a full softmax).
    m_prev = m_ref[...]                                          # (TB, 1, 1)
    m_new = jnp.maximum(m_prev, jnp.max(energy, axis=-1, keepdims=True))
    alpha = jnp.exp(m_prev - m_new)
    p = jnp.exp(energy - m_new)                                  # (TB, 1, TS)
    l_ref[...] = alpha * l_ref[...] + jnp.sum(p, axis=-1, keepdims=True)
    acc_ref[...] = alpha * acc_ref[...] + jnp.einsum(
        'bqk,bkf->bqf', p, value, preferred_element_type=jnp.float32)
    m_ref[...] = m_new

    @pl.when(s_idx == pl.num_programs(1) - 1)
    def _finalize():
        # Exact division (tiny tensor): avoids the ~2e-3 scale error of the
        # approximate EUP reciprocal that failed the previous numerics check.
        out_ref[...] = (acc_ref[...] / l_ref[...]).astype(out_ref.dtype)


def attention_pallas(key, value, token, lens, *, max_seq_tile=None):
    """key/value: (B,S,F) f32; token: (B,F) f32; lens: (B,) int -> (B,F) f32."""
    B, S, F = key.shape

    # ---- batch blocking ---------------------------------------------------
    # >= 2 batch blocks whenever B > 1 so the "parallel" batch axis actually
    # feeds both v7x TensorCores; rows-per-block capped at 8, even block count
    # preferred.  TB is a leading block dim (output is (Bp,1,F)), so it is not
    # tied to the sublane multiple-of-8 rule and small batches need no 8x pad.
    if B == 1:
        TB = 1
    else:
        nb = max(2, -(-B // 8))
        nb += nb % 2
        TB = -(-B // nb)
    n_b = -(-B // TB)
    Bp = n_b * TB

    # ---- sequence tiling ----------------------------------------------------
    # Cap each key/value block at ~2M f32 elements (8 MiB): double-buffered
    # key+value ~= 32 MiB, which fits v7x's 64 MiB VMEM with headroom and is
    # far under v5e/v6e's 128 MiB, while keeping per-step pipeline overhead
    # (~0.35 us) a small fraction of the DMA time even at v7x bandwidth.
    ts_cap = max(8, ((2 << 20) // (TB * F)) // 8 * 8)
    if max_seq_tile is not None:
        ts_cap = max(8, min(ts_cap, (max_seq_tile // 8) * 8))
    TS = S if S <= ts_cap else ts_cap
    n_s = -(-S // TS)
    Sp = n_s * TS

    # ---- host-side zero padding (removes all per-step tail cleanup) --------
    if Bp != B or Sp != S:
        key = jnp.pad(key, ((0, Bp - B), (0, Sp - S), (0, 0)))
        value = jnp.pad(value, ((0, Bp - B), (0, Sp - S), (0, 0)))
        token = jnp.pad(token, ((0, Bp - B), (0, 0)))
        lens = jnp.pad(lens, ((0, Bp - B),), constant_values=1)

    token3 = token.reshape(Bp, 1, F)
    lens3 = lens.astype(jnp.int32).reshape(Bp, 1, 1)

    out = pl.pallas_call(
        functools.partial(_attention_kernel, seq_len=S, padded_seq=Sp),
        out_shape=jax.ShapeDtypeStruct((Bp, 1, F), jnp.float32),
        grid_spec=pltpu.PrefetchScalarGridSpec(
            num_scalar_prefetch=0,
            grid=(n_b, n_s),
            in_specs=[
                pl.BlockSpec((TB, TS, F), lambda b, s: (b, s, 0)),   # key
                pl.BlockSpec((TB, TS, F), lambda b, s: (b, s, 0)),   # value
                pl.BlockSpec((TB, 1, F), lambda b, s: (b, 0, 0)),    # token
                pl.BlockSpec((TB, 1, 1), lambda b, s: (b, 0, 0)),    # lens
            ],
            out_specs=pl.BlockSpec((TB, 1, F), lambda b, s: (b, 0, 0)),
            scratch_shapes=[
                pltpu.VMEM((TB, 1, 1), jnp.float32),   # running max (m)
                pltpu.VMEM((TB, 1, 1), jnp.float32),   # running denom (l)
                pltpu.VMEM((TB, 1, F), jnp.float32),   # running context (acc)
            ],
        ),
        compiler_params=pltpu.CompilerParams(
            dimension_semantics=("parallel", "arbitrary"),
            vmem_limit_bytes=48 * 1024 * 1024,
        ),
    )(key, value, token3, lens3)

    return out[:B, 0, :]


def attention_ref(key, value, token, lens):
    """Pure-JAX reference mirroring the PyTorch forward."""
    B, S, F = key.shape
    energy = jnp.einsum("bsf,bf->bs", key, token)
    mask = jnp.arange(S)[None, :] >= lens[:, None]
    energy = jnp.where(mask, jnp.float32(-1e-09), energy)
    attention = jax.nn.softmax(energy, axis=1)
    return jnp.einsum("bs,bsf->bf", attention, value)


def _run_case(B, S, F, seed, max_seq_tile=None):
    k0, k1, k2 = jax.random.split(jax.random.PRNGKey(seed), 3)
    key = jax.random.normal(k0, (B, S, F), dtype=jnp.float32)
    value = jax.random.normal(k1, (B, S, F), dtype=jnp.float32)
    token = jax.random.normal(k2, (B, F), dtype=jnp.float32)
    lens = jnp.minimum(jnp.arange(1, B + 1) * 3 + 2, S).astype(jnp.int32)

    out = jax.block_until_ready(
        attention_pallas(key, value, token, lens, max_seq_tile=max_seq_tile))
    ref = attention_ref(key, value, token, lens)
    assert out.shape == (B, F)
    max_err = float(jnp.max(jnp.abs(out - ref)))
    assert jnp.allclose(out, ref, atol=2e-3, rtol=2e-3), max_err


if __name__ == "__main__":
    # small primary case consistent with the module (B, S, F) + lens
    _run_case(B=2, S=8, F=32, seed=0)
    # batch blocking with TB=5 (two blocks), single S tile
    _run_case(B=10, S=16, F=128, seed=1)
    # multi-tile S with non-divisible tail (host zero-pad) + padded batch
    _run_case(B=3, S=200, F=128, seed=2, max_seq_tile=64)
    print("KERNEL_OK")
</pallas_src>

<mosaic_0001>
module attributes {stable_mosaic.version = 11 : i64} {
  func.func @_attention_kernel(%arg0: i32, %arg1: i32, %arg2: memref<1x8x32xf32, #tpu.memory_space<vmem>>, %arg3: memref<1x8x32xf32, #tpu.memory_space<vmem>>, %arg4: memref<1x1x32xf32, #tpu.memory_space<vmem>>, %arg5: memref<1x1x1xi32, #tpu.memory_space<vmem>>, %arg6: memref<1x1x32xf32, #tpu.memory_space<vmem>>, %arg7: memref<1x1x1xf32, #tpu.memory_space<vmem>>, %arg8: memref<1x1x1xf32, #tpu.memory_space<vmem>>, %arg9: memref<1x1x32xf32, #tpu.memory_space<vmem>>) attributes {dimension_semantics = [#tpu.dimension_semantics<parallel>, #tpu.dimension_semantics<arbitrary>], iteration_bounds = array<i64: 2, 1>, scalar_prefetch = 0 : i64, scratch_operands = 3 : i64, tpu.core_type = #tpu.core_type<tc>, window_params = [{transform_indices = @transform_0, window_bounds = array<i64: 1, 8, 32>}, {transform_indices = @transform_1, window_bounds = array<i64: 1, 8, 32>}, {transform_indices = @transform_2, window_bounds = array<i64: 1, 1, 32>}, {transform_indices = @transform_3, window_bounds = array<i64: 1, 1, 1>}, {transform_indices = @transform_4, window_bounds = array<i64: 1, 1, 32>}]} {
    %c0_i32 = arith.constant 0 : i32
    %0 = arith.cmpi eq, %arg1, %c0_i32 : i32
    %1 = arith.extui %0 : i1 to i32
    %c0_i32_0 = arith.constant 0 : i32
    %2 = arith.cmpi ne, %1, %c0_i32_0 : i32
    scf.if %2 {
      %cst_36 = arith.constant 0xFF800000 : f32
      %41 = vector.broadcast %cst_36 : f32 to vector<1x1x1xf32>
      %c0_37 = arith.constant 0 : index
      %c0_38 = arith.constant 0 : index
      %c0_39 = arith.constant 0 : index
      %42 = vector.load %arg7[%c0_37, %c0_38, %c0_39] : memref<1x1x1xf32, #tpu.memory_space<vmem>>, vector<1x1x1xf32>
      tpu.vector_store %arg7[%c0_37, %c0_38, %c0_39], %41 {strides = array<i32>} : memref<1x1x1xf32, #tpu.memory_space<vmem>>, vector<1x1x1xf32>,
      %cst_40 = arith.constant 0.000000e+00 : f32
      %43 = vector.broadcast %cst_40 : f32 to vector<1x1x1xf32>
      %c0_41 = arith.constant 0 : index
      %c0_42 = arith.constant 0 : index
      %c0_43 = arith.constant 0 : index
      %44 = vector.load %arg8[%c0_41, %c0_42, %c0_43] : memref<1x1x1xf32, #tpu.memory_space<vmem>>, vector<1x1x1xf32>
      tpu.vector_store %arg8[%c0_41, %c0_42, %c0_43], %43 {strides = array<i32>} : memref<1x1x1xf32, #tpu.memory_space<vmem>>, vector<1x1x1xf32>,
      %cst_44 = arith.constant 0.000000e+00 : f32
      %45 = vector.broadcast %cst_44 : f32 to vector<1x1x32xf32>
      %c0_45 = arith.constant 0 : index
      %c0_46 = arith.constant 0 : index
      %c0_47 = arith.constant 0 : index
      %46 = vector.load %arg9[%c0_45, %c0_46, %c0_47] : memref<1x1x32xf32, #tpu.memory_space<vmem>>, vector<1x1x32xf32>
      tpu.vector_store %arg9[%c0_45, %c0_46, %c0_47], %45 {strides = array<i32>} : memref<1x1x32xf32, #tpu.memory_space<vmem>>, vector<1x1x32xf32>,
    } else {
    }
    %c0 = arith.constant 0 : index
    %c0_1 = arith.constant 0 : index
    %c0_2 = arith.constant 0 : index
    %3 = vector.load %arg2[%c0, %c0_1, %c0_2] : memref<1x8x32xf32, #tpu.memory_space<vmem>>, vector<1x8x32xf32>
    %c0_3 = arith.constant 0 : index
    %c0_4 = arith.constant 0 : index
    %c0_5 = arith.constant 0 : index
    %4 = vector.load %arg3[%c0_3, %c0_4, %c0_5] : memref<1x8x32xf32, #tpu.memory_space<vmem>>, vector<1x8x32xf32>
    %c0_6 = arith.constant 0 : index
    %c0_7 = arith.constant 0 : index
    %c0_8 = arith.constant 0 : index
    %5 = vector.load %arg4[%c0_6, %c0_7, %c0_8] : memref<1x1x32xf32, #tpu.memory_space<vmem>>, vector<1x1x32xf32>
    "tpu.trace_start"() <{level = 10 : i32, message = "bqf,bkf->bqk"}> : () -> ()
    %cst = arith.constant dense<0.000000e+00> : vector<1x1x8xf32>
    %6 = tpu.matmul %5, %3, %cst {dimension_numbers = #tpu.dot_dimension_numbers<[2], [2], [1], [1], [0, 0, 0, 1, 1, 1], [0], [0]>} : vector<1x1x32xf32>, vector<1x8x32xf32>, vector<1x1x8xf32> -> vector<1x1x8xf32>
    "tpu.trace_stop"() : () -> ()
    %c8_i32 = arith.constant 8 : i32
    %7 = arith.muli %arg1, %c8_i32 : i32
    %8 = tpu.iota {dimensions = array<i32: 2>} : vector<1x1x8xi32>
    %9 = vector.broadcast %7 : i32 to vector<1x1x8xi32>
    %10 = arith.addi %9, %8 : vector<1x1x8xi32>
    %c0_9 = arith.constant 0 : index
    %c0_10 = arith.constant 0 : index
    %c0_11 = arith.constant 0 : index
    %11 = vector.load %arg5[%c0_9, %c0_10, %c0_11] : memref<1x1x1xi32, #tpu.memory_space<vmem>>, vector<1x1x1xi32>
    %12 = vector.broadcast %11 : vector<1x1x1xi32> to vector<1x1x8xi32>
    %13 = arith.cmpi sge, %10, %12 : vector<1x1x8xi32>
    %cst_12 = arith.constant -9.99999971E-10 : f32
    %14 = vector.broadcast %cst_12 : f32 to vector<1x1x8xf32>
    %15 = arith.select %13, %14, %6 : vector<1x1x8xi1>, vector<1x1x8xf32>
    %c0_13 = arith.constant 0 : index
    %c0_14 = arith.constant 0 : index
    %c0_15 = arith.constant 0 : index
    %16 = vector.load %arg7[%c0_13, %c0_14, %c0_15] : memref<1x1x1xf32, #tpu.memory_space<vmem>>, vector<1x1x1xf32>
    %cst_16 = arith.constant dense<0xFF800000> : vector<1x1xf32>
    %17 = vector.multi_reduction <maximumf>, %15, %cst_16 [2] : vector<1x1x8xf32> to vector<1x1xf32>
    %18 = vector.shape_cast %17 : vector<1x1xf32> to vector<1x1x1xf32>
    %19 = arith.maximumf %16, %18 : vector<1x1x1xf32>
    %20 = arith.subf %16, %19 : vector<1x1x1xf32>
    %21 = math.exp %20 : vector<1x1x1xf32>
    %22 = vector.broadcast %19 : vector<1x1x1xf32> to vector<1x1x8xf32>
    %23 = arith.subf %15, %22 : vector<1x1x8xf32>
    %24 = math.exp %23 : vector<1x1x8xf32>
    %c0_17 = arith.constant 0 : index
    %c0_18 = arith.constant 0 : index
    %c0_19 = arith.constant 0 : index
    %25 = vector.load %arg8[%c0_17, %c0_18, %c0_19] : memref<1x1x1xf32, #tpu.memory_space<vmem>>, vector<1x1x1xf32>
    %26 = arith.mulf %21, %25 : vector<1x1x1xf32>
    %cst_20 = arith.constant dense<0.000000e+00> : vector<1x1xf32>
    %27 = vector.multi_reduction <add>, %24, %cst_20 [2] : vector<1x1x8xf32> to vector<1x1xf32>
    %28 = vector.shape_cast %27 : vector<1x1xf32> to vector<1x1x1xf32>
    %29 = arith.addf %26, %28 : vector<1x1x1xf32>
    %c0_21 = arith.constant 0 : index
    %c0_22 = arith.constant 0 : index
    %c0_23 = arith.constant 0 : index
    %30 = vector.load %arg8[%c0_21, %c0_22, %c0_23] : memref<1x1x1xf32, #tpu.memory_space<vmem>>, vector<1x1x1xf32>
    tpu.vector_store %arg8[%c0_21, %c0_22, %c0_23], %29 {strides = array<i32>} : memref<1x1x1xf32, #tpu.memory_space<vmem>>, vector<1x1x1xf32>,
    %c0_24 = arith.constant 0 : index
    %c0_25 = arith.constant 0 : index
    %c0_26 = arith.constant 0 : index
    %31 = vector.load %arg9[%c0_24, %c0_25, %c0_26] : memref<1x1x32xf32, #tpu.memory_space<vmem>>, vector<1x1x32xf32>
    %32 = vector.broadcast %21 : vector<1x1x1xf32> to vector<1x1x32xf32>
    %33 = arith.mulf %32, %31 : vector<1x1x32xf32>
    "tpu.trace_start"() <{level = 10 : i32, message = "bqk,bkf->bqf"}> : () -> ()
    %cst_27 = arith.constant dense<0.000000e+00> : vector<1x1x32xf32>
    %34 = tpu.matmul %24, %4, %cst_27 {dimension_numbers = #tpu.dot_dimension_numbers<[2], [1], [1], [2], [0, 0, 0, 1, 1, 2], [0], [0]>} : vector<1x1x8xf32>, vector<1x8x32xf32>, vector<1x1x32xf32> -> vector<1x1x32xf32>
    "tpu.trace_stop"() : () -> ()
    %35 = arith.addf %33, %34 : vector<1x1x32xf32>
    %c0_28 = arith.constant 0 : index
    %c0_29 = arith.constant 0 : index
    %c0_30 = arith.constant 0 : index
    %36 = vector.load %arg9[%c0_28, %c0_29, %c0_30] : memref<1x1x32xf32, #tpu.memory_space<vmem>>, vector<1x1x32xf32>
    tpu.vector_store %arg9[%c0_28, %c0_29, %c0_30], %35 {strides = array<i32>} : memref<1x1x32xf32, #tpu.memory_space<vmem>>, vector<1x1x32xf32>,
    %c0_31 = arith.constant 0 : index
    %c0_32 = arith.constant 0 : index
    %c0_33 = arith.constant 0 : index
    %37 = vector.load %arg7[%c0_31, %c0_32, %c0_33] : memref<1x1x1xf32, #tpu.memory_space<vmem>>, vector<1x1x1xf32>
    tpu.vector_store %arg7[%c0_31, %c0_32, %c0_33], %19 {strides = array<i32>} : memref<1x1x1xf32, #tpu.memory_space<vmem>>, vector<1x1x1xf32>,
    %c0_i32_34 = arith.constant 0 : i32
    %38 = arith.cmpi eq, %arg1, %c0_i32_34 : i32
    %39 = arith.extui %38 : i1 to i32
    %c0_i32_35 = arith.constant 0 : i32
    %40 = arith.cmpi ne, %39, %c0_i32_35 : i32
    scf.if %40 {
      %c0_36 = arith.constant 0 : index
      %c0_37 = arith.constant 0 : index
      %c0_38 = arith.constant 0 : index
      %41 = vector.load %arg9[%c0_36, %c0_37, %c0_38] : memref<1x1x32xf32, #tpu.memory_space<vmem>>, vector<1x1x32xf32>
      %c0_39 = arith.constant 0 : index
      %c0_40 = arith.constant 0 : index
      %c0_41 = arith.constant 0 : index
      %42 = vector.load %arg8[%c0_39, %c0_40, %c0_41] : memref<1x1x1xf32, #tpu.memory_space<vmem>>, vector<1x1x1xf32>
      %43 = vector.broadcast %42 : vector<1x1x1xf32> to vector<1x1x32xf32>
      %44 = arith.divf %41, %43 : vector<1x1x32xf32>
      %c0_42 = arith.constant 0 : index
      %c0_43 = arith.constant 0 : index
      %c0_44 = arith.constant 0 : index
      %45 = vector.load %arg6[%c0_42, %c0_43, %c0_44] : memref<1x1x32xf32, #tpu.memory_space<vmem>>, vector<1x1x32xf32>
      tpu.vector_store %arg6[%c0_42, %c0_43, %c0_44], %44 {strides = array<i32>} : memref<1x1x32xf32, #tpu.memory_space<vmem>>, vector<1x1x32xf32>,
    } else {
    }
    return
  }
  func.func @transform_0(%arg0: i32, %arg1: i32) -> (i32, i32, i32) {
    %c0_i32 = arith.constant 0 : i32
    %c0_i32_0 = arith.constant 0 : i32
    return %arg0, %arg1, %c0_i32 : i32, i32, i32
  }
  func.func @transform_1(%arg0: i32, %arg1: i32) -> (i32, i32, i32) {
    %c0_i32 = arith.constant 0 : i32
    %c0_i32_0 = arith.constant 0 : i32
    return %arg0, %arg1, %c0_i32 : i32, i32, i32
  }
  func.func @transform_2(%arg0: i32, %arg1: i32) -> (i32, i32, i32) {
    %c0_i32 = arith.constant 0 : i32
    %c0_i32_0 = arith.constant 0 : i32
    %c0_i32_1 = arith.constant 0 : i32
    return %arg0, %c0_i32, %c0_i32_0 : i32, i32, i32
  }
  func.func @transform_3(%arg0: i32, %arg1: i32) -> (i32, i32, i32) {
    %c0_i32 = arith.constant 0 : i32
    %c0_i32_0 = arith.constant 0 : i32
    %c0_i32_1 = arith.constant 0 : i32
    return %arg0, %c0_i32, %c0_i32_0 : i32, i32, i32
  }
  func.func @transform_4(%arg0: i32, %arg1: i32) -> (i32, i32, i32) {
    %c0_i32 = arith.constant 0 : i32
    %c0_i32_0 = arith.constant 0 : i32
    %c0_i32_1 = arith.constant 0 : i32
    return %arg0, %c0_i32, %c0_i32_0 : i32, i32, i32
  }
}

</mosaic_0001>

<bundles_post_ra>
// kernel: tpu_custom_call.1
= control target key start
LH: loop header
LB: loop body
LE: loop exit
PB: predicated region body
PF: predicated region fallthrough
CT: control target
= control target key end

     0   :  { %9 = vsyncpa [#allocation6], 0  ;;  %s1195_s0 = inlined_call_operand.hbm [shape: f32[2,8,32], index: 0, kind: input, shape index: {}]   ;;  %s1196_s1 = inlined_call_operand.hbm [shape: f32[2,8,32], index: 1, kind: input, shape index: {}]   ;;  %s1197_s2 = inlined_call_operand.vmem [shape: f32[2,1,32], index: 2, kind: input, shape index: {}]   ;;  %s1198_s3 = inlined_call_operand.vmem [shape: s32[2,1,1], index: 3, kind: input, shape index: {}]   ;;  %s1199_s4 = inlined_call_operand.hbm [shape: f32[2,1,32], index: 4, kind: output, shape index: {}]  }
   0x1   :  { %11 = vsyncpa [#allocation6 + $0x1], 0 }
   0x2   :  { %12 = vsyncpa [#allocation9], 0 }
   0x3   :  { %14 = vsyncpa [#allocation9 + $0x1], 0 }
   0x4   :  { %15 = vsyncpa [#allocation7], 0 }
   0x5   :  { %17 = vsyncpa [#allocation7 + $0x1], 0  ;;  %s954_s15 = smov 0   ;;  %s956_s16 = smov 0  }
   0x6   :  { %s958_s17 = smov 0   ;;  %s960_s18 = smov 0  }
   0x7   :  { %s962_s19 = smov 0   ;;  %s964_s20 = smov 0  }
   0x8 LB: > { %s664_s21 = sadd.s32 4294967295, %s920_s20   ;;  %s665_s22 = sadd.s32 4294967294, %s920_s20   ;;  %s920_s20 = sphi %s964_s20, %s23_s20   ;;  %s916_s19 = sphi %s962_s19, %s1219_s19   ;;  %s912_s18 = sphi %s960_s18, %s1218_s18   ;;  %s908_s17 = sphi %s958_s17, %s1217_s17   ;;  %s904_s16 = sphi %s956_s16, %s1216_s16   ;;  %s900_s15 = sphi %s954_s15, %s1215_s15  }
   0x9   : > { %s35_s23 = sadd.s32 1, %s916_s19  ;;  %s44_s24 = sadd.s32 1, %s908_s17 }
   0xa   : > { %p37_p0 = scmp.ge.s32.totalorder %s35_s23, 2  ;;  %p51_p1 = scmp.ne.s32.totalorder %s908_s17, %s904_s16 }
   0xb   : > { %p52_p2 = scmp.eq.s32.totalorder %s920_s20, 0  ;;  %p57_p3 = scmp.ne.s32.totalorder %s904_s16, %s900_s15 }
   0xc   : > { %s1221_s23 = smov (%p37_p0, %s35_s23), 0  ;;  %p58_p5 = scmp.eq.s32.totalorder %s664_s21, 0 }
   0xd   : > { %p995_p4 = por %p52_p2, %p51_p1  ;;  %s39_s26 = ssub.s32 %s916_s19, %s1221_s23 }
   0xe   : > { %p161_p6 = scmp.eq.s32.totalorder %s664_s21, 1  ;;  %p42_p7 = scmp.eq.s32.totalorder %s39_s26, 0 }
   0xf   : > { %p1001_p8 = por %p58_p5, %p57_p3  ;;  %p167_p10 = scmp.eq.s32.totalorder %s665_s22, 1 }
  0x10   : > { %p1005_p9 = por %p161_p6, %p51_p1  ;;  %p712_p13 = scmp.lt.s32.totalorder %s920_s20, 2 }
  0x11   : > { %s1203_s27 = scalar_select %p1001_p8, 1, 0 }
  0x12   : > { %s1204_s28 = scalar_select %p1005_p9, 1, 0 }
  0x13   : > { %s1010_s29 = scalar_select %p42_p7, %s908_s17, %s44_s24  }
  0x14   : > { %p1012_p11 = por %p167_p10, %p57_p3  ;;  %s1019_s5 = sand.u32 1, %s908_s17  }
  0x15   : > { %s668_s6 = sshll.u32 %s1019_s5, 3  ;;  %s669_s7 = sshll.u32 %s916_s19, 7 }
  0x16   : > { %s1205_s30 = scalar_select %p1012_p11, 1, 0 }
  0x17   : > { %s1028_s10 = scalar_lea.hbm %s1195_s0, %s669_s7  ;;  %s191_s11 = scalar_lea.vmem [#allocation5], %s668_s6 }
  0x18   : > { %s199_s12 = sshll.u32 %s191_s11, 4  ;;  %p1036_p0 = pnand %p712_p13, %p995_p4  ;;  %s1032_s12 = int_to_ptr.vmem [resolvable:$true] %s199_s12 }
  0x19   : > { %s188_s14 = scalar_lea.sflag [#allocation6], %s1019_s5  ;;  %s774_s21 = scalar_lea.hbm %s1028_s10, 128 }
  0x1a   : > { %p775_p3 = scmp.ne.s32.totalorder %s1028_s10, %s774_s21  ;;  %p776_p5 = pneg %p1036_p0 }
  0x1b   : > { %s779_s25 = scalar_lea.hbm %s1195_s0, 256  ;;  %p780_p4 = scmp.lt.u32.totalorder %s1028_s10, %s1195_s0 }
  0x1c   : > { %p777_p6 = pnand %p776_p5, %p775_p3  ;;  %p781_p10 = scmp.lt.u32.totalorder %s779_s25, %s774_s21 }
  0x1d   : > { %p783_p12 = scmp.lt.u32.totalorder %s774_s21, %s1028_s10 }
  0x1e   : > { %p778_p7 = pneg %p777_p6  ;;  %p782_p13 = por %p781_p10, %p780_p4 }
  0x20   : > { %p784_p1 = por %p783_p12, %p782_p13 }
  0x22   : > { %p785_p2 = pnand %p784_p1, %p778_p7 }
  0x24   : > { %788 = shalt.err (!%p785_p2)
}
  0x25   : > { %s789_s9 = scalar_lea.vmem %s1032_s12, 128  ;;  %s922_s11 = smov [#allocation5]  }
  0x26   : > { %p790_p3 = scmp.ne.s32.totalorder %s1032_s12, %s789_s9  ;;  %s794_s22 = sshll.u32 %s922_s11, 4  ;;  %s795_s22 = int_to_ptr.vmem [resolvable:$false] %s794_s22 }
  0x27   : > { %s796_s24 = scalar_lea.vmem %s795_s22, 256  ;;  %p797_p9 = scmp.lt.s32.totalorder %s1032_s12, %s795_s22 }
  0x28   : > { %p792_p6 = pnand %p790_p3, %p776_p5  ;;  %p798_p4 = scmp.lt.s32.totalorder %s796_s24, %s789_s9 }
  0x2a   : > { %p793_p11 = pneg %p792_p6  ;;  %p799_p10 = por %p798_p4, %p797_p9 }
  0x2c   : > { %p800_p12 = pnand %p799_p10, %p793_p11 }
  0x2e   : > { %803 = shalt.err (!%p800_p12)
}
  0x2f   : > { %704 = dma.hbm_to_vmem [thread:$0]  (!%p1036_p0), %s1028_s10, 128, %s1032_s12, %s188_s14  }
  0x30   : > { %p1207_p1 = scmp.lt.s32.totalorder %s920_s20, 3  ;;  %p1208_p2 = scmp.ge.s32.totalorder %s920_s20, 1 }
  0x31   : > { %s1081_s8 = scalar_lea.hbm %s1196_s1, %s669_s7  ;;  %s210_s9 = scalar_lea.vmem [#allocation8], %s668_s6 }
  0x32   : > { %p1072_p7 = pnand %p1208_p2, %p1207_p1  ;;  %s218_s11 = sshll.u32 %s210_s9, 4  ;;  %s219_s11 = int_to_ptr.vmem [resolvable:$true] %s218_s11 }
  0x33   : > { %s207_s10 = scalar_lea.sflag [#allocation9], %s1019_s5  ;;  %s804_s12 = scalar_lea.hbm %s1081_s8, 128 }
  0x34   : > { %s1209_s21 = scalar_select %p1072_p7, 1, 0 }
  0x35   : > { %p805_p9 = scmp.ne.s32.totalorder %s1081_s8, %s804_s12  ;;  %s809_s7 = scalar_lea.hbm %s1196_s1, 256 }
  0x36   : > { %p810_p3 = scmp.lt.u32.totalorder %s1081_s8, %s1196_s1  ;;  %p811_p6 = scmp.lt.u32.totalorder %s809_s7, %s804_s12 }
  0x37   : > { %p807_p11 = pnand %p805_p9, %p776_p5  ;;  %p813_p10 = scmp.lt.u32.totalorder %s804_s12, %s1081_s8 }
  0x38   : > { %p812_p4 = por %p811_p6, %p810_p3 }
  0x39   : > { %p808_p13 = pneg %p807_p11 }
  0x3a   : > { %p814_p12 = por %p813_p10, %p812_p4 }
  0x3c   : > { %p815_p1 = pnand %p814_p12, %p808_p13 }
  0x3e   : > { %818 = shalt.err (!%p815_p1)
}
  0x3f   : > { %s819_s5 = scalar_lea.vmem %s219_s11, 128  ;;  %s923_s6 = smov [#allocation8]  }
  0x40   : > { %p820_p2 = scmp.ne.s32.totalorder %s219_s11, %s819_s5  ;;  %s824_s26 = sshll.u32 %s923_s6, 4  ;;  %s825_s26 = int_to_ptr.vmem [resolvable:$false] %s824_s26 }
  0x41   : > { %s826_s9 = scalar_lea.vmem %s825_s26, 256  ;;  %p827_p8 = scmp.lt.s32.totalorder %s219_s11, %s825_s26 }
  0x42   : > { %p822_p9 = pnand %p820_p2, %p776_p5  ;;  %p828_p7 = scmp.lt.s32.totalorder %s826_s9, %s819_s5 }
  0x44   : > { %p823_p11 = pneg %p822_p9  ;;  %p829_p3 = por %p828_p7, %p827_p8 }
  0x46   : > { %p830_p6 = pnand %p829_p3, %p823_p11 }
  0x48   : > { %833 = shalt.err (!%p830_p6)
}
  0x49   : > { %707 = dma.hbm_to_vmem [thread:$0]  (!%p1036_p0), %s1081_s8, 128, %s219_s11, %s207_s10  }
  0x4a   : > { %p1210_p13 = scmp.ne.s32.totalorder %s1209_s21, 0 }
  0x4b   : > { %s1108_s12 = sand.u32 (!%p1210_p13), 1, %s904_s16   ;;  %p1211_p5 = scmp.ne.s32.totalorder (!%p1210_p13), %s1203_s27, 0 }
  0x4c   : > { %239 = sbr.rel (%p1210_p13) target bundleno = 906 (0x38a), region = 36  ;;  %s673_s14 = sshll.u32 (!%p1210_p13), %s1108_s12, 3 }
  0x4d   : > { %s242_s22 = scalar_lea.sflag (!%p1210_p13), [#allocation6], %s1108_s12  ;;  %s245_s7 = scalar_lea.vmem (!%p1210_p13), [#allocation5], %s673_s14 }
  0x53   : > { %887 = dma.done.wait (%p1211_p5), %s242_s22, 128  }
  0x54   : > { %889 = vsyncadd (%p1211_p5), %s242_s22, 4294967168  ;;  %s251_s13 = scalar_lea.sflag [#allocation9], %s1108_s12  ;;  %s1117_s8 = scalar_lea.vmem [#allocation8], %s673_s14 }
  0x55   : > { %891 = dma.done.wait (%p1211_p5), %s251_s13, 128  }
  0x56   : > { %893 = vsyncadd (%p1211_p5), %s251_s13, 4294967168  ;;  %p289_p8 = scmp.lt.s32.totalorder %s912_s18, 1  ;;  %v924_v0 = vmov 0.0   ;;  %vm925_vm0 = vmmov 0   ;;  %v926_v1 = vmov 0   ;;  %vm307_vm1 = vcmask 261120  }
  0x57   : > { %685 = vmatprep.subr.mxu0 %v924_v0  ;;  %687 = vmatprep.mubr.msk.f32.mxu0 %vm925_vm0, %v924_v0  ;;  %v304_v2 = vld [vmem:[%s245_s7] sm:$0xff]  ;;  %vm299_vm2 = vcmask 0   ;;  %v927_v5 = vmov -inf   ;;  %v385_v6 = vlaneseq  ;;  %vm400_vm4 = vcmask 57344   ;;  %v305_v22 = vld [vmem:[%s1117_s8] sm:$0xff]  ;;  %s678_s6 = sshll.u32 %s912_s18, 4 }
  0x58   : > { %s290_s21 = scalar_select %p289_p8, %s912_s18, 1  ;;  %766 = vset.pattern.permute.xlu0 %v926_v1  ;;  %767 = vset.pattern.permute.xlu1 %v926_v1  ;;  %300 = vst.msk [vmem:[#allocation2] sm:$0x1] %vm299_vm2, %v927_v5  ;;  %301 = vst.msk [vmem:[#allocation3] sm:$0x1] %vm299_vm2, %v924_v0  ;;  %vm302_vm5 = vcmask 253952  }
  0x59   : > { %690 = vmatprep.subr.mxu1 %v924_v0  ;;  %692 = vmatprep.mubr.msk.f32.mxu1 %vm925_vm0, %v924_v0  ;;  %v394_v7 = vshrl.u32 %v385_v6, 7  ;;  %v386_v11 = vand.u32 127, %v385_v6  ;;  %303 = vst.msk [vmem:[#allocation4] sm:$0x1] %vm302_vm5, %v924_v0  ;;  %vm439_vm6 = vcmask 64512   ;;  %s288_s26 = scalar_lea.vmem [#allocation10], %s1108_s12  ;;  %s1145_s7 = scalar_lea.hbm %s1199_s4, %s678_s6 }
  0x5a   : > { %s294_s24 = scalar_lea.vmem %s1198_s3, %s290_s21  ;;  %s291_s5 = scalar_lea.vmem %s1197_s2, %s290_s21  ;;  %686 = vmatpush3.xpose.msk.msra.mxu0 %vm307_vm1, %v304_v2  ;;  %691 = vmatpush3.msra.mxu1 %v305_v22 }
  0x5b   : > { %v389_v3 = vld [vmem:[%s294_s24] sm:$0x1]  ;;  %v395_v8 = vsub.s32 0, %v394_v7  ;;  %s547_s9 = sshll.u32 %s288_s26, 4  ;;  %s535_s13 = scalar_lea.sflag [#allocation7], %s1108_s12  ;;  %s1147_s9 = int_to_ptr.vmem [resolvable:$true] %s547_s9 }
  0x5c   : > { %v306_v4 = vld [vmem:[%s291_s5] sm:$0x1]  ;;  %391 = vperm.xlu0 %766, %v389_v3   ;;  %s834_s8 = scalar_lea.vmem %s1147_s9, 16  ;;  %p1212_p7 = scmp.ne.s32.totalorder %s1204_s28, 0 }
  0x5d   : > { %688 = vmatmul.mubr.msk.f32.vlgmr.msra.gmra.mrb[0].mxu0 %vm307_vm1, %v306_v4  ;;  %p835_p0 = scmp.ne.s32.totalorder %s1147_s9, %s834_s8  ;;  %s928_s18 = smov [#allocation10]  }
  0x5e   : > { %s838_s21 = sshll.u32 %s928_s18, 4  ;;  %s839_s21 = int_to_ptr.vmem [resolvable:$false] %s838_s21 }
  0x5f   : > { %v399_v16 = vld [vmem:[#allocation2] sm:$0x1]  ;;  %v420_v29 = vld [vmem:[#allocation3] sm:$0x1]  ;;  %p836_p4 = pnand %p835_p0, %p1212_p7  ;;  %s840_s11 = scalar_lea.vmem %s839_s21, 32 }
  0x60   : > { %v428_v36 = vld [vmem:[#allocation4] sm:$0x1]  ;;  %p841_p12 = scmp.lt.s32.totalorder %s1147_s9, %s839_s21  ;;  %p842_p1 = scmp.lt.s32.totalorder %s840_s11, %s834_s8 }
  0x61   : > { %p837_p10 = pneg %p836_p4 }
  0x62   : > { %p843_p2 = por %p842_p1, %p841_p12 }
  0x64   : > { %p844_p9 = pnand %p843_p2, %p837_p10 }
  0xdb   : > { %v392_v9 = vpop.permute.xlu0 %391 }
  0xdc   : > { %v396_v10 = vrot.slane %v392_v9, %v395_v8 }
  0xde   : > { %vm397_vm3 = vcmp.ge.s32.totalorder %v386_v11, %v396_v10 }
 0x130   : > { %v380_v12 = vpop.f32.mrb[0].mxu0 }
 0x131   : > { %v398_v13 = vsel %vm397_vm3, -1e-09, %v380_v12  ;;  %v689_v14 = vpop.f32.mrb[1].mxu0 }
 0x132   : > { %v401_v15 = vsel %vm400_vm4, %v398_v13, -inf }
 0x133   : > { %402 = vmax.xlane.f32.xlu0 %v401_v15 }
 0x1c0   : > { %v403_v17 = vpop.xlane.xlu0 %402 }
 0x1c1   : > { %v404_v18 = vmax.f32 %v399_v16, %v403_v17 }
 0x1c3   : > { %v405_v19 = vsub.f32 %v399_v16, %v404_v18  ;;  %516 = vst.msk [vmem:[#allocation2] sm:$0x1] %vm299_vm2, %v404_v18  ;;  %410 = vperm.xlu1 %767, %v404_v18  }
 0x1c5   : > { %v406_v20 = vmul.f32 1.442695, %v405_v19 }
 0x1c7   : > { %768 = vpow2.f32 %v406_v20 }
 0x1d1   : > { %v769_v21 = vpop.eup %768 }
 0x1d2   : > { %431 = vperm.xlu0 %766, %v769_v21   ;;  %v421_v30 = vmul.f32 %v769_v21, %v420_v29 }
 0x242   : > { %v411_v23 = vpop.permute.xlu1 %410 }
 0x243   : > { %v416_v24 = vrot.slane %v411_v23, %v395_v8 }
 0x245   : > { %v417_v25 = vsub.f32 %v398_v13, %v416_v24 }
 0x247   : > { %v418_v26 = vmul.f32 1.442695, %v417_v25 }
 0x249   : > { %770 = vpow2.f32 %v418_v26 }
 0x251   : > { %v432_v34 = vpop.permute.xlu0 %431 }
 0x252   : > { %v437_v35 = vrot.slane %v432_v34, %v395_v8 }
 0x253   : > { %v771_v27 = vpop.eup %770 }
 0x254   : > { %693 = vmatmul.mubr.msk.f32.vlgmr.msra.gmra.mrb[0].mxu1 %vm439_vm6, %v771_v27  ;;  %v422_v28 = vsel %vm400_vm4, %v771_v27, 0.0  ;;  %v438_v37 = vmul.f32 %v437_v35, %v428_v36 }
 0x255   : > { %423 = vadd.xlane.f32.xlu1 %v422_v28 }
 0x2e2   : > { %v424_v31 = vpop.xlane.xlu1 %423 }
 0x2e3   : > { %v425_v32 = vadd.f32 %v424_v31, %v421_v30 }
 0x2e5   : > { %427 = vst.msk [vmem:[#allocation3] sm:$0x1] %vm299_vm2, %v425_v32 }
 0x2ec   : > { %v521_v33 = vld [vmem:[#allocation3] sm:$0x1] }
 0x2ed   : > { %524 = vperm.xlu1 %767, %v521_v33  }
 0x327   : > { %v509_v38 = vpop.f32.mrb[0].mxu1 }
 0x328   : > { %v513_v39 = vadd.f32 %v509_v38, %v438_v37  ;;  %v694_v40 = vpop.f32.mrb[1].mxu1 }
 0x32a   : > { %515 = vst.msk [vmem:[#allocation4] sm:$0x1] %vm302_vm5, %v513_v39 }
 0x331   : > { %v520_v44 = vld [vmem:[#allocation4] sm:$0x1] }
 0x36c   : > { %v525_v41 = vpop.permute.xlu1 %524 }
 0x36d   : > { %v530_v42 = vrot.slane %v525_v41, %v395_v8 }
 0x36f   : > { %772 = vrcp.f32 %v530_v42 }
 0x379   : > { %v773_v43 = vpop.eup %772 }
 0x37a   : > { %v532_v45 = vmul.f32 %v773_v43, %v520_v44 }
 0x37c   : > { %533 = vst.msk [vmem:[%s288_s26] sm:$0x1] %vm302_vm5, %v532_v45 }
 0x37d   : > { %847 = shalt.err (!%p844_p9)
}
 0x37e   : > { %s848_s12 = scalar_lea.hbm %s1145_s7, 16  ;;  %s852_s27 = scalar_lea.hbm %s1199_s4, 32 }
 0x37f   : > { %p849_p11 = scmp.ne.s32.totalorder %s1145_s7, %s848_s12  ;;  %p853_p13 = scmp.lt.u32.totalorder %s1145_s7, %s1199_s4 }
 0x380   : > { %p854_p5 = scmp.lt.u32.totalorder %s852_s27, %s848_s12  ;;  %p856_p0 = scmp.lt.u32.totalorder %s848_s12, %s1145_s7 }
 0x381   : > { %p850_p3 = pnand %p849_p11, %p1212_p7 }
 0x382   : > { %p855_p8 = por %p854_p5, %p853_p13 }
 0x383   : > { %p851_p6 = pneg %p850_p3 }
 0x384   : > { %p857_p4 = por %p856_p0, %p855_p8 }
 0x386   : > { %p858_p10 = pnand %p857_p4, %p851_p6 }
 0x388   : > { %861 = shalt.err (!%p858_p10)
}
 0x389   : > { %699 = dma.vmem_to_hbm [thread:$0]  (%p1212_p7), %s1147_s9, 16, %s1145_s7, %s535_s13  }
 0x38a PF: > { %s559_s6 = sand.u32 1, %s900_s15   ;;  %p1213_p12 = scmp.ne.s32.totalorder %s1205_s30, 0 }
 0x38b   : > { %p1214_p1 = scmp.ge.s32.totalorder %s920_s20, 2  ;;  %s560_s26 = scalar_lea.sflag [#allocation7], %s559_s6 }
 0x38d   : > { %p709_p2 = pnand %p1214_p1, %p1213_p12 }
 0x38f   : > { %895 = dma.done.wait (!%p709_p2), %s560_s26, 16  }
 0x390   : > { %897 = vsyncadd (!%p709_p2), %s560_s26, 4294967280  ;;  %s23_s20 = sadd.s32 1, %s920_s20   ;;  %s1215_s15 = smov %s904_s16 }
 0x391   : > { %p20_p9 = scmp.ge.s32.totalorder %s23_s20, 4   ;;  %s1216_s16 = smov %s908_s17 }
 0x392   : > { %s1217_s17 = smov %s1010_s29  ;;  %s1218_s18 = smov %s916_s19 }
 0x393   : > { %s1219_s19 = smov %s1221_s23  ;;  %22 = sbr.rel (!%p20_p9) target bundleno = 8 (0x8), region = 108 }
 0x39a   :  { %564 = vsyncpa [#allocation6], 1 }
 0x39b   :  { %566 = vsyncpa [#allocation6 + $0x1], 1 }
 0x39c   :  { %567 = vsyncpa [#allocation9], 1 }
 0x39d   :  { %569 = vsyncpa [#allocation9 + $0x1], 1 }
 0x39e   :  { %570 = vsyncpa [#allocation7], 1 }
 0x39f   :  { %572 = vsyncpa [#allocation7 + $0x1], 1 }

</bundles_post_ra>
